<compile_context>
chip_gen: v6e
topology: v6e:2x2x1
jax: 0.10.0
libtpu: 0.0.40
codegen_flags: <defaults>
</compile_context>

<pallas_src>
import math

import jax
import jax.numpy as jnp
from jax.experimental import pallas as pl
from jax.experimental.pallas import tpu as pltpu

_LANE = 128
_MAX_B_TILE = 1024  # cap on the square transpose tile side (Case B)


def _round_up(x: int, m: int) -> int:
    return -(-x // m) * m


def _round_down(x: int, m: int) -> int:
    return (x // m) * m


def _sublane(dtype) -> int:
    # dtype-aware packed sublane height: f32 -> 8, bf16 -> 16, int8/fp8 -> 32.
    return max(8, 32 // jnp.dtype(dtype).itemsize)


def _vmem_capacity_bytes() -> int:
    try:
        cap = int(pltpu.get_tpu_info().vmem_capacity_bytes)
        if cap > 0:
            return cap
    except Exception:
        pass
    return 64 << 20  # conservative default (v7x per-TensorCore VMEM)


# --------------------------- kernel bodies ----------------------------------


def _copy_block_kernel(x_ref, o_ref):
    """Case A1: both refs are (bd0, bR); the swap is done by the index maps."""
    o_ref[...] = x_ref[...]


def _copy_loop_kernel(x_ref, o_ref):
    """Case A2: x_ref (bd0, bd1, R) -> o_ref (bd1, bd0, R).

    Loop over bd1: dense (bd0, R) stores into o_ref, strided reads from x_ref
    (the strided reads are hidden under the block DMA).
    """
    for j in range(o_ref.shape[0]):
        o_ref[j] = x_ref[:, j, :]


def _transpose_tile_kernel(x_ref, o_ref):
    """Case B: x_ref (bd0, bd1) -> o_ref (bd1, bd0): one XLU tile transpose."""
    o_ref[...] = x_ref[...].T


# --------------------------- wrapper ----------------------------------------


def transpose_pallas(x: jax.Array, dim0: int, dim1: int, *,
                     _per_buffer_bytes: int | None = None) -> jax.Array:
    """Pallas equivalent of torch.Tensor.transpose(dim0, dim1)."""
    ndim = x.ndim
    if ndim == 0:
        return x
    dim0 = dim0 % ndim
    dim1 = dim1 % ndim
    if dim0 == dim1:
        return x
    if dim0 > dim1:
        dim0, dim1 = dim1, dim0

    out_shape = list(x.shape)
    out_shape[dim0], out_shape[dim1] = out_shape[dim1], out_shape[dim0]
    out_shape = tuple(out_shape)

    s = x.shape
    A = math.prod(s[:dim0])
    D0 = s[dim0]
    M = math.prod(s[dim0 + 1:dim1])
    D1 = s[dim1]
    R = math.prod(s[dim1 + 1:])

    # Zero-size arrays / size-1 swapped dims: pure (free) reshape.
    if x.size == 0 or D0 == 1 or D1 == 1:
        return x.reshape(out_shape)

    itemsize = jnp.dtype(x.dtype).itemsize
    sub = _sublane(x.dtype)
    cap = _vmem_capacity_bytes()
    # in+out double-buffered => ~4x per-buffer footprint; keep the pipeline
    # well under physical VMEM (64 MiB v7x, 128 MiB v5e/v6e).
    per_buffer = _per_buffer_bytes if _per_buffer_bytes is not None else max(
        4 << 20, min(cap // 8, 12 << 20))
    vmem_limit = min(cap * 3 // 4, 128 << 20)
    cost = pl.CostEstimate(flops=0, transcendentals=0,
                           bytes_accessed=2 * x.size * itemsize)

    if R > 1 and R * itemsize >= 512:
        # ----- Case A1: lane-sized trailing dim -> pure whole-block copy -----
        x_c = x.reshape(A, D0, M, D1, R)
        out_c_shape = (A, D1, M, D0, R)

        # Prefer full R for the lane tile; otherwise a large multiple of 128.
        if _round_up(R, _LANE) * sub * itemsize <= per_buffer:
            bR = R
        else:
            bR = max(_LANE, _round_down(per_buffer // (sub * itemsize), _LANE))
        rows = max(1, per_buffer // (_round_up(bR, _LANE) * itemsize))
        bd0 = D0 if rows >= D0 else min(D0, max(sub, _round_down(rows, sub)))

        # r (lane-chunk) axis innermost: sequential HBM access on both sides.
        grid = (A, M, D1, pl.cdiv(D0, bd0), pl.cdiv(R, bR))
        in_spec = pl.BlockSpec((None, bd0, None, None, bR),
                               lambda a, m, j, i, r: (a, i, m, j, r))
        out_spec = pl.BlockSpec((None, None, None, bd0, bR),
                                lambda a, m, j, i, r: (a, j, m, i, r))
        kernel = _copy_block_kernel
    elif R > 1:
        # ----- Case A2: small trailing dim -> block D1, loop with dense stores
        x_c = x.reshape(A, D0, M, D1, R)
        out_c_shape = (A, D1, M, D0, R)

        # bd1 sized so the contiguous input run bd1*R stays >= ~1 KiB.
        bd1 = _round_up(pl.cdiv(1024, R * itemsize), sub)
        bd1 = min(bd1, 64)
        if bd1 >= D1:
            bd1 = D1
        row_bytes = _round_up(bd1, sub) * _round_up(R, _LANE) * itemsize
        rows = max(1, per_buffer // row_bytes)
        bd0 = D0 if rows >= D0 else min(D0, max(sub, _round_down(rows, sub)))

        # Keep both v7x TensorCores busy: never a single-step grid if avoidable.
        if A * M * pl.cdiv(D1, bd1) * pl.cdiv(D0, bd0) < 2:
            if D0 >= 2 * sub:
                bd0 = _round_up(pl.cdiv(D0, 2), sub)
            elif D1 >= 2 * sub:
                bd1 = _round_up(pl.cdiv(D1, 2), sub)

        grid = (A, M, pl.cdiv(D1, bd1), pl.cdiv(D0, bd0))
        in_spec = pl.BlockSpec((None, bd0, None, bd1, R),
                               lambda a, m, j, i: (a, i, m, j, 0))
        out_spec = pl.BlockSpec((None, bd1, None, bd0, R),
                                lambda a, m, j, i: (a, j, m, i, 0))
        kernel = _copy_loop_kernel
    else:
        # ----- Case B: swap involves the last (lane) dim -> tiled 2-D .T -----
        x_c = x.reshape(A, D0, M, D1)
        out_c_shape = (A, D1, M, D0)

        bbudget = min(per_buffer, 2 << 20)
        side = _LANE
        while 4 * side * side * itemsize <= bbudget and 2 * side <= _MAX_B_TILE:
            side *= 2
        bd0 = D0 if D0 <= side else side
        bd1 = D1 if D1 <= side else side

        if A * M * pl.cdiv(D1, bd1) * pl.cdiv(D0, bd0) < 2:
            if D0 >= 2 * _LANE:
                bd0 = _round_up(pl.cdiv(D0, 2), _LANE)
            elif D1 >= 2 * _LANE:
                bd1 = _round_up(pl.cdiv(D1, 2), _LANE)

        grid = (A, M, pl.cdiv(D1, bd1), pl.cdiv(D0, bd0))
        in_spec = pl.BlockSpec((None, bd0, None, bd1),
                               lambda a, m, j, i: (a, i, m, j))
        out_spec = pl.BlockSpec((None, bd1, None, bd0),
                                lambda a, m, j, i: (a, j, m, i))
        kernel = _transpose_tile_kernel

    out_c = pl.pallas_call(
        kernel,
        out_shape=jax.ShapeDtypeStruct(out_c_shape, x.dtype),
        grid=grid,
        in_specs=[in_spec],
        out_specs=out_spec,
        compiler_params=pltpu.CompilerParams(
            dimension_semantics=("parallel",) * len(grid),
            vmem_limit_bytes=vmem_limit),
        cost_estimate=cost,
    )(x_c)

    return out_c.reshape(out_shape)


class TransposePallas:
    """Mirror of the PyTorch Transpose module: forward(*args) -> list."""

    def __init__(self, dim0: int, dim1: int) -> None:
        self.dim0 = dim0
        self.dim1 = dim1

    def __call__(self, *args):
        return [transpose_pallas(a, self.dim0, self.dim1) for a in args]


if __name__ == "__main__":
    key = jax.random.PRNGKey(0)
    keys = jax.random.split(key, 10)

    def check(out, ref):
        assert out.shape == ref.shape, (out.shape, ref.shape)
        assert out.dtype == ref.dtype, (out.dtype, ref.dtype)
        assert bool(jnp.array_equal(out, ref)), "value mismatch"

    # Module under test: swap dims 1 and 2 of every input.
    op = TransposePallas(dim0=1, dim1=2)
    x = jax.random.normal(keys[0], (2, 4, 16, 16), dtype=jnp.float32)   # A2 (small trailing dim)
    y = jax.random.normal(keys[1], (2, 8, 32), dtype=jnp.float32)       # B  (swap hits lane dim)
    z = jax.random.normal(keys[2], (2, 6, 8, 128), dtype=jnp.float32)   # A1 (pure-copy relayout)
    outs = [jax.block_until_ready(o) for o in op(x, y, z)]
    for o, a in zip(outs, (x, y, z)):
        check(o, jnp.swapaxes(a, 1, 2))

    # Ragged / partial-block and dtype coverage (forced small budgets tile dims).
    extra = [
        # (array, dim0, dim1, forced per-buffer bytes)
        (jax.random.normal(keys[3], (1, 20, 3, 130), jnp.float32), 1, 2, 8 << 10),   # A1 partial D0
        (jax.random.normal(keys[4], (1, 10, 3, 300), jnp.float32), 1, 2, 4 << 10),   # A1 partial D0 & R
        (jax.random.normal(keys[5], (1, 11, 7, 5), jnp.float32), 1, 2, 8 << 10),     # A2 partial D0
        (jax.random.normal(keys[6], (1, 37, 150), jnp.float32), 1, 2, 64 << 10),     # B partial lane blocks
        (jax.random.normal(keys[7], (2, 3, 40, 64), jnp.float32).astype(jnp.bfloat16), 1, 2, None),  # A2 bf16
        (jax.random.normal(keys[8], (2, 5, 3, 7), jnp.float32), 1, 3, None),          # B with middle dim M>1
        (jax.random.normal(keys[9], (3, 4, 5, 6), jnp.float32), 0, 2, None),          # non-adjacent swap, M>1
    ]
    for a, d0, d1, budget in extra:
        o = jax.block_until_ready(transpose_pallas(a, d0, d1, _per_buffer_bytes=budget))
        check(o, jnp.swapaxes(a, d0, d1))

    # Degenerate paths (no data movement).
    w = jax.random.normal(keys[0], (1, 7, 5), jnp.float32)
    check(transpose_pallas(w, 0, 1), jnp.swapaxes(w, 0, 1))   # size-1 swapped dim -> reshape
    check(transpose_pallas(w, 2, 2), w)                        # dim0 == dim1 -> identity

    print("KERNEL_OK")
</pallas_src>

<mosaic_0001>
module attributes {stable_mosaic.version = 11 : i64} {
  func.func @_copy_loop_kernel(%arg0: i32, %arg1: i32, %arg2: i32, %arg3: i32, %arg4: memref<1x4x1x16x16xf32, #tpu.memory_space<vmem>>, %arg5: memref<1x16x1x4x16xf32, #tpu.memory_space<vmem>>) attributes {dimension_semantics = [#tpu.dimension_semantics<parallel>, #tpu.dimension_semantics<parallel>, #tpu.dimension_semantics<parallel>, #tpu.dimension_semantics<parallel>], iteration_bounds = array<i64: 2, 1, 1, 1>, scalar_prefetch = 0 : i64, scratch_operands = 0 : i64, tpu.core_type = #tpu.core_type<tc>, window_params = [{transform_indices = @transform_0, window_bounds = array<i64: 1, 4, 1, 16, 16>}, {transform_indices = @transform_1, window_bounds = array<i64: 1, 16, 1, 4, 16>}]} {
    %c0 = arith.constant 0 : index
    %c0_0 = arith.constant 0 : index
    %c0_1 = arith.constant 0 : index
    %c0_2 = arith.constant 0 : index
    %c0_3 = arith.constant 0 : index
    %0 = vector.load %arg4[%c0, %c0_0, %c0_1, %c0_2, %c0_3] : memref<1x4x1x16x16xf32, #tpu.memory_space<vmem>>, vector<1x4x1x1x16xf32>
    %1 = vector.shape_cast %0 : vector<1x4x1x1x16xf32> to vector<4x16xf32>
    %c0_4 = arith.constant 0 : index
    %c0_5 = arith.constant 0 : index
    %c0_6 = arith.constant 0 : index
    %c0_7 = arith.constant 0 : index
    %c0_8 = arith.constant 0 : index
    %2 = vector.load %arg5[%c0_4, %c0_5, %c0_6, %c0_7, %c0_8] : memref<1x16x1x4x16xf32, #tpu.memory_space<vmem>>, vector<1x1x1x4x16xf32>
    %3 = vector.shape_cast %2 : vector<1x1x1x4x16xf32> to vector<4x16xf32>
    %4 = vector.shape_cast %1 : vector<4x16xf32> to vector<1x1x1x4x16xf32>
    tpu.vector_store %arg5[%c0_4, %c0_5, %c0_6, %c0_7, %c0_8], %4 {strides = array<i32>} : memref<1x16x1x4x16xf32, #tpu.memory_space<vmem>>, vector<1x1x1x4x16xf32>,
    %c0_9 = arith.constant 0 : index
    %c0_10 = arith.constant 0 : index
    %c0_11 = arith.constant 0 : index
    %c1 = arith.constant 1 : index
    %c0_12 = arith.constant 0 : index
    %5 = vector.load %arg4[%c0_9, %c0_10, %c0_11, %c1, %c0_12] : memref<1x4x1x16x16xf32, #tpu.memory_space<vmem>>, vector<1x4x1x1x16xf32>
    %6 = vector.shape_cast %5 : vector<1x4x1x1x16xf32> to vector<4x16xf32>
    %c0_13 = arith.constant 0 : index
    %c1_14 = arith.constant 1 : index
    %c0_15 = arith.constant 0 : index
    %c0_16 = arith.constant 0 : index
    %c0_17 = arith.constant 0 : index
    %7 = vector.load %arg5[%c0_13, %c1_14, %c0_15, %c0_16, %c0_17] : memref<1x16x1x4x16xf32, #tpu.memory_space<vmem>>, vector<1x1x1x4x16xf32>
    %8 = vector.shape_cast %7 : vector<1x1x1x4x16xf32> to vector<4x16xf32>
    %9 = vector.shape_cast %6 : vector<4x16xf32> to vector<1x1x1x4x16xf32>
    tpu.vector_store %arg5[%c0_13, %c1_14, %c0_15, %c0_16, %c0_17], %9 {strides = array<i32>} : memref<1x16x1x4x16xf32, #tpu.memory_space<vmem>>, vector<1x1x1x4x16xf32>,
    %c0_18 = arith.constant 0 : index
    %c0_19 = arith.constant 0 : index
    %c0_20 = arith.constant 0 : index
    %c2 = arith.constant 2 : index
    %c0_21 = arith.constant 0 : index
    %10 = vector.load %arg4[%c0_18, %c0_19, %c0_20, %c2, %c0_21] : memref<1x4x1x16x16xf32, #tpu.memory_space<vmem>>, vector<1x4x1x1x16xf32>
    %11 = vector.shape_cast %10 : vector<1x4x1x1x16xf32> to vector<4x16xf32>
    %c0_22 = arith.constant 0 : index
    %c2_23 = arith.constant 2 : index
    %c0_24 = arith.constant 0 : index
    %c0_25 = arith.constant 0 : index
    %c0_26 = arith.constant 0 : index
    %12 = vector.load %arg5[%c0_22, %c2_23, %c0_24, %c0_25, %c0_26] : memref<1x16x1x4x16xf32, #tpu.memory_space<vmem>>, vector<1x1x1x4x16xf32>
    %13 = vector.shape_cast %12 : vector<1x1x1x4x16xf32> to vector<4x16xf32>
    %14 = vector.shape_cast %11 : vector<4x16xf32> to vector<1x1x1x4x16xf32>
    tpu.vector_store %arg5[%c0_22, %c2_23, %c0_24, %c0_25, %c0_26], %14 {strides = array<i32>} : memref<1x16x1x4x16xf32, #tpu.memory_space<vmem>>, vector<1x1x1x4x16xf32>,
    %c0_27 = arith.constant 0 : index
    %c0_28 = arith.constant 0 : index
    %c0_29 = arith.constant 0 : index
    %c3 = arith.constant 3 : index
    %c0_30 = arith.constant 0 : index
    %15 = vector.load %arg4[%c0_27, %c0_28, %c0_29, %c3, %c0_30] : memref<1x4x1x16x16xf32, #tpu.memory_space<vmem>>, vector<1x4x1x1x16xf32>
    %16 = vector.shape_cast %15 : vector<1x4x1x1x16xf32> to vector<4x16xf32>
    %c0_31 = arith.constant 0 : index
    %c3_32 = arith.constant 3 : index
    %c0_33 = arith.constant 0 : index
    %c0_34 = arith.constant 0 : index
    %c0_35 = arith.constant 0 : index
    %17 = vector.load %arg5[%c0_31, %c3_32, %c0_33, %c0_34, %c0_35] : memref<1x16x1x4x16xf32, #tpu.memory_space<vmem>>, vector<1x1x1x4x16xf32>
    %18 = vector.shape_cast %17 : vector<1x1x1x4x16xf32> to vector<4x16xf32>
    %19 = vector.shape_cast %16 : vector<4x16xf32> to vector<1x1x1x4x16xf32>
    tpu.vector_store %arg5[%c0_31, %c3_32, %c0_33, %c0_34, %c0_35], %19 {strides = array<i32>} : memref<1x16x1x4x16xf32, #tpu.memory_space<vmem>>, vector<1x1x1x4x16xf32>,
    %c0_36 = arith.constant 0 : index
    %c0_37 = arith.constant 0 : index
    %c0_38 = arith.constant 0 : index
    %c4 = arith.constant 4 : index
    %c0_39 = arith.constant 0 : index
    %20 = vector.load %arg4[%c0_36, %c0_37, %c0_38, %c4, %c0_39] : memref<1x4x1x16x16xf32, #tpu.memory_space<vmem>>, vector<1x4x1x1x16xf32>
    %21 = vector.shape_cast %20 : vector<1x4x1x1x16xf32> to vector<4x16xf32>
    %c0_40 = arith.constant 0 : index
    %c4_41 = arith.constant 4 : index
    %c0_42 = arith.constant 0 : index
    %c0_43 = arith.constant 0 : index
    %c0_44 = arith.constant 0 : index
    %22 = vector.load %arg5[%c0_40, %c4_41, %c0_42, %c0_43, %c0_44] : memref<1x16x1x4x16xf32, #tpu.memory_space<vmem>>, vector<1x1x1x4x16xf32>
    %23 = vector.shape_cast %22 : vector<1x1x1x4x16xf32> to vector<4x16xf32>
    %24 = vector.shape_cast %21 : vector<4x16xf32> to vector<1x1x1x4x16xf32>
    tpu.vector_store %arg5[%c0_40, %c4_41, %c0_42, %c0_43, %c0_44], %24 {strides = array<i32>} : memref<1x16x1x4x16xf32, #tpu.memory_space<vmem>>, vector<1x1x1x4x16xf32>,
    %c0_45 = arith.constant 0 : index
    %c0_46 = arith.constant 0 : index
    %c0_47 = arith.constant 0 : index
    %c5 = arith.constant 5 : index
    %c0_48 = arith.constant 0 : index
    %25 = vector.load %arg4[%c0_45, %c0_46, %c0_47, %c5, %c0_48] : memref<1x4x1x16x16xf32, #tpu.memory_space<vmem>>, vector<1x4x1x1x16xf32>
    %26 = vector.shape_cast %25 : vector<1x4x1x1x16xf32> to vector<4x16xf32>
    %c0_49 = arith.constant 0 : index
    %c5_50 = arith.constant 5 : index
    %c0_51 = arith.constant 0 : index
    %c0_52 = arith.constant 0 : index
    %c0_53 = arith.constant 0 : index
    %27 = vector.load %arg5[%c0_49, %c5_50, %c0_51, %c0_52, %c0_53] : memref<1x16x1x4x16xf32, #tpu.memory_space<vmem>>, vector<1x1x1x4x16xf32>
    %28 = vector.shape_cast %27 : vector<1x1x1x4x16xf32> to vector<4x16xf32>
    %29 = vector.shape_cast %26 : vector<4x16xf32> to vector<1x1x1x4x16xf32>
    tpu.vector_store %arg5[%c0_49, %c5_50, %c0_51, %c0_52, %c0_53], %29 {strides = array<i32>} : memref<1x16x1x4x16xf32, #tpu.memory_space<vmem>>, vector<1x1x1x4x16xf32>,
    %c0_54 = arith.constant 0 : index
    %c0_55 = arith.constant 0 : index
    %c0_56 = arith.constant 0 : index
    %c6 = arith.constant 6 : index
    %c0_57 = arith.constant 0 : index
    %30 = vector.load %arg4[%c0_54, %c0_55, %c0_56, %c6, %c0_57] : memref<1x4x1x16x16xf32, #tpu.memory_space<vmem>>, vector<1x4x1x1x16xf32>
    %31 = vector.shape_cast %30 : vector<1x4x1x1x16xf32> to vector<4x16xf32>
    %c0_58 = arith.constant 0 : index
    %c6_59 = arith.constant 6 : index
    %c0_60 = arith.constant 0 : index
    %c0_61 = arith.constant 0 : index
    %c0_62 = arith.constant 0 : index
    %32 = vector.load %arg5[%c0_58, %c6_59, %c0_60, %c0_61, %c0_62] : memref<1x16x1x4x16xf32, #tpu.memory_space<vmem>>, vector<1x1x1x4x16xf32>
    %33 = vector.shape_cast %32 : vector<1x1x1x4x16xf32> to vector<4x16xf32>
    %34 = vector.shape_cast %31 : vector<4x16xf32> to vector<1x1x1x4x16xf32>
    tpu.vector_store %arg5[%c0_58, %c6_59, %c0_60, %c0_61, %c0_62], %34 {strides = array<i32>} : memref<1x16x1x4x16xf32, #tpu.memory_space<vmem>>, vector<1x1x1x4x16xf32>,
    %c0_63 = arith.constant 0 : index
    %c0_64 = arith.constant 0 : index
    %c0_65 = arith.constant 0 : index
    %c7 = arith.constant 7 : index
    %c0_66 = arith.constant 0 : index
    %35 = vector.load %arg4[%c0_63, %c0_64, %c0_65, %c7, %c0_66] : memref<1x4x1x16x16xf32, #tpu.memory_space<vmem>>, vector<1x4x1x1x16xf32>
    %36 = vector.shape_cast %35 : vector<1x4x1x1x16xf32> to vector<4x16xf32>
    %c0_67 = arith.constant 0 : index
    %c7_68 = arith.constant 7 : index
    %c0_69 = arith.constant 0 : index
    %c0_70 = arith.constant 0 : index
    %c0_71 = arith.constant 0 : index
    %37 = vector.load %arg5[%c0_67, %c7_68, %c0_69, %c0_70, %c0_71] : memref<1x16x1x4x16xf32, #tpu.memory_space<vmem>>, vector<1x1x1x4x16xf32>
    %38 = vector.shape_cast %37 : vector<1x1x1x4x16xf32> to vector<4x16xf32>
    %39 = vector.shape_cast %36 : vector<4x16xf32> to vector<1x1x1x4x16xf32>
    tpu.vector_store %arg5[%c0_67, %c7_68, %c0_69, %c0_70, %c0_71], %39 {strides = array<i32>} : memref<1x16x1x4x16xf32, #tpu.memory_space<vmem>>, vector<1x1x1x4x16xf32>,
    %c0_72 = arith.constant 0 : index
    %c0_73 = arith.constant 0 : index
    %c0_74 = arith.constant 0 : index
    %c8 = arith.constant 8 : index
    %c0_75 = arith.constant 0 : index
    %40 = vector.load %arg4[%c0_72, %c0_73, %c0_74, %c8, %c0_75] : memref<1x4x1x16x16xf32, #tpu.memory_space<vmem>>, vector<1x4x1x1x16xf32>
    %41 = vector.shape_cast %40 : vector<1x4x1x1x16xf32> to vector<4x16xf32>
    %c0_76 = arith.constant 0 : index
    %c8_77 = arith.constant 8 : index
    %c0_78 = arith.constant 0 : index
    %c0_79 = arith.constant 0 : index
    %c0_80 = arith.constant 0 : index
    %42 = vector.load %arg5[%c0_76, %c8_77, %c0_78, %c0_79, %c0_80] : memref<1x16x1x4x16xf32, #tpu.memory_space<vmem>>, vector<1x1x1x4x16xf32>
    %43 = vector.shape_cast %42 : vector<1x1x1x4x16xf32> to vector<4x16xf32>
    %44 = vector.shape_cast %41 : vector<4x16xf32> to vector<1x1x1x4x16xf32>
    tpu.vector_store %arg5[%c0_76, %c8_77, %c0_78, %c0_79, %c0_80], %44 {strides = array<i32>} : memref<1x16x1x4x16xf32, #tpu.memory_space<vmem>>, vector<1x1x1x4x16xf32>,
    %c0_81 = arith.constant 0 : index
    %c0_82 = arith.constant 0 : index
    %c0_83 = arith.constant 0 : index
    %c9 = arith.constant 9 : index
    %c0_84 = arith.constant 0 : index
    %45 = vector.load %arg4[%c0_81, %c0_82, %c0_83, %c9, %c0_84] : memref<1x4x1x16x16xf32, #tpu.memory_space<vmem>>, vector<1x4x1x1x16xf32>
    %46 = vector.shape_cast %45 : vector<1x4x1x1x16xf32> to vector<4x16xf32>
    %c0_85 = arith.constant 0 : index
    %c9_86 = arith.constant 9 : index
    %c0_87 = arith.constant 0 : index
    %c0_88 = arith.constant 0 : index
    %c0_89 = arith.constant 0 : index
    %47 = vector.load %arg5[%c0_85, %c9_86, %c0_87, %c0_88, %c0_89] : memref<1x16x1x4x16xf32, #tpu.memory_space<vmem>>, vector<1x1x1x4x16xf32>
    %48 = vector.shape_cast %47 : vector<1x1x1x4x16xf32> to vector<4x16xf32>
    %49 = vector.shape_cast %46 : vector<4x16xf32> to vector<1x1x1x4x16xf32>
    tpu.vector_store %arg5[%c0_85, %c9_86, %c0_87, %c0_88, %c0_89], %49 {strides = array<i32>} : memref<1x16x1x4x16xf32, #tpu.memory_space<vmem>>, vector<1x1x1x4x16xf32>,
    %c0_90 = arith.constant 0 : index
    %c0_91 = arith.constant 0 : index
    %c0_92 = arith.constant 0 : index
    %c10 = arith.constant 10 : index
    %c0_93 = arith.constant 0 : index
    %50 = vector.load %arg4[%c0_90, %c0_91, %c0_92, %c10, %c0_93] : memref<1x4x1x16x16xf32, #tpu.memory_space<vmem>>, vector<1x4x1x1x16xf32>
    %51 = vector.shape_cast %50 : vector<1x4x1x1x16xf32> to vector<4x16xf32>
    %c0_94 = arith.constant 0 : index
    %c10_95 = arith.constant 10 : index
    %c0_96 = arith.constant 0 : index
    %c0_97 = arith.constant 0 : index
    %c0_98 = arith.constant 0 : index
    %52 = vector.load %arg5[%c0_94, %c10_95, %c0_96, %c0_97, %c0_98] : memref<1x16x1x4x16xf32, #tpu.memory_space<vmem>>, vector<1x1x1x4x16xf32>
    %53 = vector.shape_cast %52 : vector<1x1x1x4x16xf32> to vector<4x16xf32>
    %54 = vector.shape_cast %51 : vector<4x16xf32> to vector<1x1x1x4x16xf32>
    tpu.vector_store %arg5[%c0_94, %c10_95, %c0_96, %c0_97, %c0_98], %54 {strides = array<i32>} : memref<1x16x1x4x16xf32, #tpu.memory_space<vmem>>, vector<1x1x1x4x16xf32>,
    %c0_99 = arith.constant 0 : index
    %c0_100 = arith.constant 0 : index
    %c0_101 = arith.constant 0 : index
    %c11 = arith.constant 11 : index
    %c0_102 = arith.constant 0 : index
    %55 = vector.load %arg4[%c0_99, %c0_100, %c0_101, %c11, %c0_102] : memref<1x4x1x16x16xf32, #tpu.memory_space<vmem>>, vector<1x4x1x1x16xf32>
    %56 = vector.shape_cast %55 : vector<1x4x1x1x16xf32> to vector<4x16xf32>
    %c0_103 = arith.constant 0 : index
    %c11_104 = arith.constant 11 : index
    %c0_105 = arith.constant 0 : index
    %c0_106 = arith.constant 0 : index
    %c0_107 = arith.constant 0 : index
    %57 = vector.load %arg5[%c0_103, %c11_104, %c0_105, %c0_106, %c0_107] : memref<1x16x1x4x16xf32, #tpu.memory_space<vmem>>, vector<1x1x1x4x16xf32>
    %58 = vector.shape_cast %57 : vector<1x1x1x4x16xf32> to vector<4x16xf32>
    %59 = vector.shape_cast %56 : vector<4x16xf32> to vector<1x1x1x4x16xf32>
    tpu.vector_store %arg5[%c0_103, %c11_104, %c0_105, %c0_106, %c0_107], %59 {strides = array<i32>} : memref<1x16x1x4x16xf32, #tpu.memory_space<vmem>>, vector<1x1x1x4x16xf32>,
    %c0_108 = arith.constant 0 : index
    %c0_109 = arith.constant 0 : index
    %c0_110 = arith.constant 0 : index
    %c12 = arith.constant 12 : index
    %c0_111 = arith.constant 0 : index
    %60 = vector.load %arg4[%c0_108, %c0_109, %c0_110, %c12, %c0_111] : memref<1x4x1x16x16xf32, #tpu.memory_space<vmem>>, vector<1x4x1x1x16xf32>
    %61 = vector.shape_cast %60 : vector<1x4x1x1x16xf32> to vector<4x16xf32>
    %c0_112 = arith.constant 0 : index
    %c12_113 = arith.constant 12 : index
    %c0_114 = arith.constant 0 : index
    %c0_115 = arith.constant 0 : index
    %c0_116 = arith.constant 0 : index
    %62 = vector.load %arg5[%c0_112, %c12_113, %c0_114, %c0_115, %c0_116] : memref<1x16x1x4x16xf32, #tpu.memory_space<vmem>>, vector<1x1x1x4x16xf32>
    %63 = vector.shape_cast %62 : vector<1x1x1x4x16xf32> to vector<4x16xf32>
    %64 = vector.shape_cast %61 : vector<4x16xf32> to vector<1x1x1x4x16xf32>
    tpu.vector_store %arg5[%c0_112, %c12_113, %c0_114, %c0_115, %c0_116], %64 {strides = array<i32>} : memref<1x16x1x4x16xf32, #tpu.memory_space<vmem>>, vector<1x1x1x4x16xf32>,
    %c0_117 = arith.constant 0 : index
    %c0_118 = arith.constant 0 : index
    %c0_119 = arith.constant 0 : index
    %c13 = arith.constant 13 : index
    %c0_120 = arith.constant 0 : index
    %65 = vector.load %arg4[%c0_117, %c0_118, %c0_119, %c13, %c0_120] : memref<1x4x1x16x16xf32, #tpu.memory_space<vmem>>, vector<1x4x1x1x16xf32>
    %66 = vector.shape_cast %65 : vector<1x4x1x1x16xf32> to vector<4x16xf32>
    %c0_121 = arith.constant 0 : index
    %c13_122 = arith.constant 13 : index
    %c0_123 = arith.constant 0 : index
    %c0_124 = arith.constant 0 : index
    %c0_125 = arith.constant 0 : index
    %67 = vector.load %arg5[%c0_121, %c13_122, %c0_123, %c0_124, %c0_125] : memref<1x16x1x4x16xf32, #tpu.memory_space<vmem>>, vector<1x1x1x4x16xf32>
    %68 = vector.shape_cast %67 : vector<1x1x1x4x16xf32> to vector<4x16xf32>
    %69 = vector.shape_cast %66 : vector<4x16xf32> to vector<1x1x1x4x16xf32>
    tpu.vector_store %arg5[%c0_121, %c13_122, %c0_123, %c0_124, %c0_125], %69 {strides = array<i32>} : memref<1x16x1x4x16xf32, #tpu.memory_space<vmem>>, vector<1x1x1x4x16xf32>,
    %c0_126 = arith.constant 0 : index
    %c0_127 = arith.constant 0 : index
    %c0_128 = arith.constant 0 : index
    %c14 = arith.constant 14 : index
    %c0_129 = arith.constant 0 : index
    %70 = vector.load %arg4[%c0_126, %c0_127, %c0_128, %c14, %c0_129] : memref<1x4x1x16x16xf32, #tpu.memory_space<vmem>>, vector<1x4x1x1x16xf32>
    %71 = vector.shape_cast %70 : vector<1x4x1x1x16xf32> to vector<4x16xf32>
    %c0_130 = arith.constant 0 : index
    %c14_131 = arith.constant 14 : index
    %c0_132 = arith.constant 0 : index
    %c0_133 = arith.constant 0 : index
    %c0_134 = arith.constant 0 : index
    %72 = vector.load %arg5[%c0_130, %c14_131, %c0_132, %c0_133, %c0_134] : memref<1x16x1x4x16xf32, #tpu.memory_space<vmem>>, vector<1x1x1x4x16xf32>
    %73 = vector.shape_cast %72 : vector<1x1x1x4x16xf32> to vector<4x16xf32>
    %74 = vector.shape_cast %71 : vector<4x16xf32> to vector<1x1x1x4x16xf32>
    tpu.vector_store %arg5[%c0_130, %c14_131, %c0_132, %c0_133, %c0_134], %74 {strides = array<i32>} : memref<1x16x1x4x16xf32, #tpu.memory_space<vmem>>, vector<1x1x1x4x16xf32>,
    %c0_135 = arith.constant 0 : index
    %c0_136 = arith.constant 0 : index
    %c0_137 = arith.constant 0 : index
    %c15 = arith.constant 15 : index
    %c0_138 = arith.constant 0 : index
    %75 = vector.load %arg4[%c0_135, %c0_136, %c0_137, %c15, %c0_138] : memref<1x4x1x16x16xf32, #tpu.memory_space<vmem>>, vector<1x4x1x1x16xf32>
    %76 = vector.shape_cast %75 : vector<1x4x1x1x16xf32> to vector<4x16xf32>
    %c0_139 = arith.constant 0 : index
    %c15_140 = arith.constant 15 : index
    %c0_141 = arith.constant 0 : index
    %c0_142 = arith.constant 0 : index
    %c0_143 = arith.constant 0 : index
    %77 = vector.load %arg5[%c0_139, %c15_140, %c0_141, %c0_142, %c0_143] : memref<1x16x1x4x16xf32, #tpu.memory_space<vmem>>, vector<1x1x1x4x16xf32>
    %78 = vector.shape_cast %77 : vector<1x1x1x4x16xf32> to vector<4x16xf32>
    %79 = vector.shape_cast %76 : vector<4x16xf32> to vector<1x1x1x4x16xf32>
    tpu.vector_store %arg5[%c0_139, %c15_140, %c0_141, %c0_142, %c0_143], %79 {strides = array<i32>} : memref<1x16x1x4x16xf32, #tpu.memory_space<vmem>>, vector<1x1x1x4x16xf32>,
    return
  }
  func.func @transform_0(%arg0: i32, %arg1: i32, %arg2: i32, %arg3: i32) -> (i32, i32, i32, i32, i32) {
    %c0_i32 = arith.constant 0 : i32
    %c0_i32_0 = arith.constant 0 : i32
    return %arg0, %arg3, %arg1, %arg2, %c0_i32 : i32, i32, i32, i32, i32
  }
  func.func @transform_1(%arg0: i32, %arg1: i32, %arg2: i32, %arg3: i32) -> (i32, i32, i32, i32, i32) {
    %c0_i32 = arith.constant 0 : i32
    %c0_i32_0 = arith.constant 0 : i32
    return %arg0, %arg2, %arg1, %arg3, %c0_i32 : i32, i32, i32, i32, i32
  }
}

</mosaic_0001>

<bundles_post_ra>
// kernel: tpu_custom_call.1
= control target key start
LH: loop header
LB: loop body
LE: loop exit
PB: predicated region body
PF: predicated region fallthrough
CT: control target
= control target key end

     0   :  { %6 = vsyncpa [#allocation3], 0  ;;  %s1098_s0 = inlined_call_operand.hbm [shape: f32[2,4,1,16,16], index: 0, kind: input, shape index: {}]   ;;  %s1099_s1 = inlined_call_operand.hbm [shape: f32[2,16,1,4,16], index: 1, kind: output, shape index: {}]  }
   0x1   :  { %8 = vsyncpa [#allocation3 + $0x1], 0 }
   0x2   :  { %9 = vsyncpa [#allocation4], 0 }
   0x3   :  { %11 = vsyncpa [#allocation4 + $0x1], 0  ;;  %s799_s6 = smov 0   ;;  %s801_s7 = smov 0  }
   0x4   :  { %s803_s8 = smov 0   ;;  %s805_s9 = smov 0  }
   0x5   :  { %s807_s10 = smov 0   ;;  %s809_s11 = smov 0  }
   0x6 LB: > { %s575_s12 = sadd.s32 4294967295, %s781_s11   ;;  %s576_s13 = sadd.s32 4294967294, %s781_s11   ;;  %s781_s11 = sphi %s809_s11, %s17_s11   ;;  %s777_s10 = sphi %s807_s10, %s1110_s10   ;;  %s773_s9 = sphi %s805_s9, %s1109_s9   ;;  %s769_s8 = sphi %s803_s8, %s1108_s8   ;;  %s765_s7 = sphi %s801_s7, %s1107_s7   ;;  %s761_s6 = sphi %s799_s6, %s1106_s6  }
   0x7   : > { %s43_s14 = sadd.s32 1, %s777_s10  ;;  %s56_s15 = sadd.s32 1, %s769_s8 }
   0x8   : > { %p45_p0 = scmp.ge.s32.totalorder %s43_s14, 2  ;;  %p63_p1 = scmp.ne.s32.totalorder %s769_s8, %s765_s7 }
   0x9   : > { %p64_p2 = scmp.eq.s32.totalorder %s781_s11, 0  ;;  %p69_p3 = scmp.ne.s32.totalorder %s765_s7, %s761_s6 }
   0xa   : > { %s1112_s14 = smov (%p45_p0, %s43_s14), 0  ;;  %p70_p5 = scmp.eq.s32.totalorder %s575_s12, 0 }
   0xb   : > { %p840_p4 = por %p64_p2, %p63_p1  ;;  %s47_s17 = ssub.s32 %s777_s10, %s1112_s14 }
   0xc   : > { %p99_p6 = scmp.eq.s32.totalorder %s575_s12, 1  ;;  %p54_p7 = scmp.eq.s32.totalorder %s47_s17, 0 }
   0xd   : > { %p846_p8 = por %p70_p5, %p69_p3  ;;  %p105_p10 = scmp.eq.s32.totalorder %s576_s13, 1 }
   0xe   : > { %p850_p9 = por %p99_p6, %p63_p1  ;;  %p619_p13 = scmp.lt.s32.totalorder %s781_s11, 2 }
   0xf   : > { %s855_s20 = scalar_select %p54_p7, %s769_s8, %s56_s15  }
  0x10   : > { %p857_p11 = por %p105_p10, %p69_p3  ;;  %s125_s22 = sand.u32 1, %s769_s8  }
  0x11   : > { %s579_s23 = sshll.u32 %s125_s22, 6  ;;  %s605_s24 = sshll.u32 %s777_s10, 10 }
  0x12   : > { %s142_s27 = scalar_lea.hbm %s1098_s0, %s605_s24  ;;  %s129_s28 = scalar_lea.vmem [#allocation2], %s579_s23 }
  0x13   : > { %s143_s29 = sshll.u32 %s129_s28, 4  ;;  %p870_p0 = pnand %p619_p13, %p840_p4  ;;  %s144_s29 = int_to_ptr.vmem [resolvable:$true] %s143_s29 }
  0x14   : > { %p582_p1 = scmp.ge.s32.totalorder %s781_s11, 1  ;;  %s126_s2 = scalar_lea.sflag [#allocation3], %s125_s22 }
  0x15   : > { %p675_p2 = pneg %p870_p0  ;;  %s686_s3 = scalar_lea.vmem %s144_s29, 1024 }
  0x16   : > { %p687_p3 = scmp.ne.s32.totalorder %s144_s29, %s686_s3  ;;  %s783_s4 = smov [#allocation2]  }
  0x17   : > { %s691_s5 = sshll.u32 %s783_s4, 4  ;;  %s692_s5 = int_to_ptr.vmem [resolvable:$false] %s691_s5 }
  0x18   : > { %p689_p5 = pnand %p687_p3, %p675_p2  ;;  %s693_s12 = scalar_lea.vmem %s692_s5, 2048 }
  0x19   : > { %p694_p7 = scmp.lt.s32.totalorder %s144_s29, %s692_s5  ;;  %p695_p10 = scmp.lt.s32.totalorder %s693_s12, %s686_s3 }
  0x1a   : > { %p690_p6 = pneg %p689_p5 }
  0x1b   : > { %p696_p12 = por %p695_p10, %p694_p7 }
  0x1d   : > { %p697_p4 = pnand %p696_p12, %p690_p6 }
  0x1f   : > { %700 = shalt.err (!%p697_p4)
}
  0x20   : > { %s784_s13 = smov 128   ;;  %s785_s15 = smov 8  }
  0x21   : > { %614 = dma.hbm_to_vmem [thread:$0]  (!%p870_p0), %s142_s27, 1024, %s144_s29, %s126_s2, %s784_s13, %s784_s13, %s785_s15  }
  0x22   : > { %p151_p13 = scmp.lt.s32.totalorder %s781_s11, 3 }
  0x24   : > { %p152_p2 = pnand %p582_p1, %p151_p13 }
  0x25   : > { %s883_s16 = sand.u32 (!%p152_p2), 1, %s765_s7  }
  0x26   : > { %155 = sbr.rel (%p152_p2) target bundleno = 99 (0x63), region = 24  ;;  %s583_s17 = sshll.u32 (!%p152_p2), %s883_s16, 6 }
  0x27   : > { %s158_s22 = scalar_lea.sflag (!%p152_p2), [#allocation3], %s883_s16  ;;  %s889_s23 = scalar_lea.vmem (!%p152_p2), [#allocation2], %s583_s17 }
  0x2b   : > { %752 = dma.done.wait (%p846_p8), %s158_s22, 1024  }
  0x2c   : > { %754 = vsyncadd (%p846_p8), %s158_s22, 4294966272  ;;  %vm192_vm0 = vcmask 1041409   ;;  %vm195_vm1 = vcmask 1042434   ;;  %vm198_vm2 = vcmask 1043459   ;;  %v183_v0 = vld [vmem:[%s889_s23] sm:$0x1] }
  0x2d   : > { %v184_v1 = vld [vmem:[%s889_s23 + $0x10] sm:$0x1]  ;;  %v185_v2 = vld [vmem:[%s889_s23 + $0x20] sm:$0x1]  ;;  %v203_v6 = vld [vmem:[%s889_s23 + $0x1] sm:$0x1] }
  0x2e   : > { %v186_v3 = vld [vmem:[%s889_s23 + $0x30] sm:$0x1]  ;;  %v191_v4 = vrot.slane %v184_v1, 7  ;;  %v194_v5 = vrot.slane %v185_v2, 6  ;;  %vm201_vm3 = vcmask 125952   ;;  %s914_s18 = scalar_lea.vmem [#allocation5], %s583_s17 }
  0x2f   : > { %v197_v7 = vrot.slane %v186_v3, 5  ;;  %v204_v8 = vld [vmem:[%s889_s23 + $0x11] sm:$0x1]  ;;  %v205_v9 = vld [vmem:[%s889_s23 + $0x21] sm:$0x1]  ;;  %s606_s24 = sshll.u32 %s773_s9, 10 }
  0x30   : > { %v193_v10 = vsel %vm192_vm0, %v191_v4, %v183_v0  ;;  %v206_v11 = vld [vmem:[%s889_s23 + $0x31] sm:$0x1]  ;;  %v211_v12 = vrot.slane %v204_v8, 7  ;;  %v213_v13 = vrot.slane %v205_v9, 6  ;;  %v220_v14 = vld [vmem:[%s889_s23 + $0x2] sm:$0x1]  ;;  %s1042_s27 = scalar_lea.hbm %s1099_s1, %s606_s24 }
  0x31   : > { %v196_v15 = vsel %vm195_vm1, %v194_v5, %v193_v10  ;;  %v215_v16 = vrot.slane %v206_v11, 5  ;;  %v221_v17 = vld [vmem:[%s889_s23 + $0x12] sm:$0x1]  ;;  %v222_v18 = vld [vmem:[%s889_s23 + $0x22] sm:$0x1]  ;;  %s476_s25 = sshll.u32 %s914_s18, 4  ;;  %s1044_s25 = int_to_ptr.vmem [resolvable:$true] %s476_s25 }
  0x32   : > { %v199_v19 = vsel %vm198_vm2, %v197_v7, %v196_v15  ;;  %v212_v20 = vsel %vm192_vm0, %v211_v12, %v203_v6  ;;  %v223_v21 = vld [vmem:[%s889_s23 + $0x32] sm:$0x1]  ;;  %v228_v22 = vrot.slane %v221_v17, 7  ;;  %v230_v23 = vrot.slane %v222_v18, 6  ;;  %v237_v24 = vld [vmem:[%s889_s23 + $0x3] sm:$0x1] }
  0x33   : > { %202 = vst.msk [vmem:[%s914_s18] sm:$0xf] %vm201_vm3, %v199_v19  ;;  %v214_v25 = vsel %vm195_vm1, %v213_v13, %v212_v20  ;;  %v232_v26 = vrot.slane %v223_v21, 5  ;;  %v238_v27 = vld [vmem:[%s889_s23 + $0x13] sm:$0x1]  ;;  %s459_s28 = scalar_lea.sflag [#allocation4], %s883_s16 }
  0x34   : > { %v239_v28 = vld [vmem:[%s889_s23 + $0x23] sm:$0x1]  ;;  %v216_v29 = vsel %vm198_vm2, %v215_v16, %v214_v25  ;;  %v229_v30 = vsel %vm192_vm0, %v228_v22, %v220_v14  ;;  %v240_v31 = vld [vmem:[%s889_s23 + $0x33] sm:$0x1]  ;;  %v245_v32 = vrot.slane %v238_v27, 7  ;;  %s701_s29 = scalar_lea.vmem %s1044_s25, 1024 }
  0x35   : > { %v247_v33 = vrot.slane %v239_v28, 6  ;;  %v254_v34 = vld [vmem:[%s889_s23 + $0x4] sm:$0x1]  ;;  %585 = vst.msk [vmem:[%s914_s18 + $0x4] sm:$0xf] %vm201_vm3, %v216_v29  ;;  %v231_v35 = vsel %vm195_vm1, %v230_v23, %v229_v30  ;;  %v249_v36 = vrot.slane %v240_v31, 5  ;;  %p702_p8 = scmp.ne.s32.totalorder %s1044_s25, %s701_s29 }
  0x36   : > { %v255_v37 = vld [vmem:[%s889_s23 + $0x14] sm:$0x1]  ;;  %v256_v38 = vld [vmem:[%s889_s23 + $0x24] sm:$0x1]  ;;  %v233_v39 = vsel %vm198_vm2, %v232_v26, %v231_v35  ;;  %v246_v40 = vsel %vm192_vm0, %v245_v32, %v237_v24  ;;  %v271_v44 = vld [vmem:[%s889_s23 + $0x5] sm:$0x1] }
  0x37   : > { %v257_v41 = vld [vmem:[%s889_s23 + $0x34] sm:$0x1]  ;;  %v262_v42 = vrot.slane %v255_v37, 7  ;;  %v264_v43 = vrot.slane %v256_v38, 6  ;;  %586 = vst.msk [vmem:[%s914_s18 + $0x8] sm:$0xf] %vm201_vm3, %v233_v39  ;;  %v248_v45 = vsel %vm195_vm1, %v247_v33, %v246_v40  ;;  %p703_p12 = pnand %p702_p8, %p850_p9 }
  0x38   : > { %v266_v46 = vrot.slane %v257_v41, 5  ;;  %v272_v47 = vld [vmem:[%s889_s23 + $0x15] sm:$0x1]  ;;  %v273_v48 = vld [vmem:[%s889_s23 + $0x25] sm:$0x1]  ;;  %v250_v49 = vsel %vm198_vm2, %v249_v36, %v248_v45  ;;  %s786_s30 = smov [#allocation5]  }
  0x39   : > { %v263_v50 = vsel %vm192_vm0, %v262_v42, %v254_v34  ;;  %v274_v51 = vld [vmem:[%s889_s23 + $0x35] sm:$0x1]  ;;  %v279_v52 = vrot.slane %v272_v47, 7  ;;  %v281_v53 = vrot.slane %v273_v48, 6  ;;  %v288_v54 = vld [vmem:[%s889_s23 + $0x6] sm:$0x1]  ;;  %p704_p0 = pneg %p703_p12 }
  0x3a   : > { %587 = vst.msk [vmem:[%s914_s18 + $0xc] sm:$0xf] %vm201_vm3, %v250_v49  ;;  %v265_v55 = vsel %vm195_vm1, %v264_v43, %v263_v50  ;;  %v283_v56 = vrot.slane %v274_v51, 5  ;;  %v289_v57 = vld [vmem:[%s889_s23 + $0x16] sm:$0x1]  ;;  %s705_s2 = sshll.u32 %s786_s30, 4  ;;  %s706_s2 = int_to_ptr.vmem [resolvable:$false] %s705_s2 }
  0x3b   : > { %v290_v58 = vld [vmem:[%s889_s23 + $0x26] sm:$0x1]  ;;  %v267_v59 = vsel %vm198_vm2, %v266_v46, %v265_v55  ;;  %v280_v60 = vsel %vm192_vm0, %v279_v52, %v271_v44  ;;  %v291_v61 = vld [vmem:[%s889_s23 + $0x36] sm:$0x1]  ;;  %v296_v62 = vrot.slane %v289_v57, 7  ;;  %s707_s3 = scalar_lea.vmem %s706_s2, 2048  ;;  %p708_p1 = scmp.lt.s32.totalorder %s1044_s25, %s706_s2 }
  0x3c   : > { %v298_v63 = vrot.slane %v290_v58, 6  ;;  %v305_v0 = vld [vmem:[%s889_s23 + $0x7] sm:$0x1]  ;;  %588 = vst.msk [vmem:[%s914_s18 + $0x10] sm:$0xf] %vm201_vm3, %v267_v59  ;;  %v282_v1 = vsel %vm195_vm1, %v281_v53, %v280_v60  ;;  %v300_v2 = vrot.slane %v291_v61, 5  ;;  %p709_p3 = scmp.lt.s32.totalorder %s707_s3, %s701_s29 }
  0x3d   : > { %v306_v3 = vld [vmem:[%s889_s23 + $0x17] sm:$0x1]  ;;  %v307_v4 = vld [vmem:[%s889_s23 + $0x27] sm:$0x1]  ;;  %v284_v5 = vsel %vm198_vm2, %v283_v56, %v282_v1  ;;  %v297_v6 = vsel %vm192_vm0, %v296_v62, %v288_v54  ;;  %v322_v10 = vld [vmem:[%s889_s23 + $0x8] sm:$0x1] }
  0x3e   : > { %v308_v7 = vld [vmem:[%s889_s23 + $0x37] sm:$0x1]  ;;  %v313_v8 = vrot.slane %v306_v3, 7  ;;  %v315_v9 = vrot.slane %v307_v4, 6  ;;  %589 = vst.msk [vmem:[%s914_s18 + $0x14] sm:$0xf] %vm201_vm3, %v284_v5  ;;  %v299_v11 = vsel %vm195_vm1, %v298_v63, %v297_v6  ;;  %p710_p5 = por %p709_p3, %p708_p1 }
  0x3f   : > { %v317_v12 = vrot.slane %v308_v7, 5  ;;  %v323_v13 = vld [vmem:[%s889_s23 + $0x18] sm:$0x1]  ;;  %v324_v14 = vld [vmem:[%s889_s23 + $0x28] sm:$0x1]  ;;  %v301_v15 = vsel %vm198_vm2, %v300_v2, %v299_v11 }
  0x40   : > { %v314_v16 = vsel %vm192_vm0, %v313_v8, %v305_v0  ;;  %v325_v17 = vld [vmem:[%s889_s23 + $0x38] sm:$0x1]  ;;  %v330_v18 = vrot.slane %v323_v13, 7  ;;  %v332_v19 = vrot.slane %v324_v14, 6  ;;  %v339_v20 = vld [vmem:[%s889_s23 + $0x9] sm:$0x1]  ;;  %p711_p6 = pnand %p710_p5, %p704_p0 }
  0x41   : > { %590 = vst.msk [vmem:[%s914_s18 + $0x18] sm:$0xf] %vm201_vm3, %v301_v15  ;;  %v316_v21 = vsel %vm195_vm1, %v315_v9, %v314_v16  ;;  %v334_v22 = vrot.slane %v325_v17, 5  ;;  %v340_v23 = vld [vmem:[%s889_s23 + $0x19] sm:$0x1] }
  0x42   : > { %v341_v24 = vld [vmem:[%s889_s23 + $0x29] sm:$0x1]  ;;  %v318_v25 = vsel %vm198_vm2, %v317_v12, %v316_v21  ;;  %v331_v26 = vsel %vm192_vm0, %v330_v18, %v322_v10  ;;  %v342_v27 = vld [vmem:[%s889_s23 + $0x39] sm:$0x1]  ;;  %v347_v28 = vrot.slane %v340_v23, 7 }
  0x43   : > { %v349_v29 = vrot.slane %v341_v24, 6  ;;  %v356_v30 = vld [vmem:[%s889_s23 + $0xa] sm:$0x1]  ;;  %591 = vst.msk [vmem:[%s914_s18 + $0x1c] sm:$0xf] %vm201_vm3, %v318_v25  ;;  %v333_v31 = vsel %vm195_vm1, %v332_v19, %v331_v26  ;;  %v351_v32 = vrot.slane %v342_v27, 5 }
  0x44   : > { %v357_v33 = vld [vmem:[%s889_s23 + $0x1a] sm:$0x1]  ;;  %v358_v34 = vld [vmem:[%s889_s23 + $0x2a] sm:$0x1]  ;;  %v335_v35 = vsel %vm198_vm2, %v334_v22, %v333_v31  ;;  %v348_v36 = vsel %vm192_vm0, %v347_v28, %v339_v20  ;;  %v373_v40 = vld [vmem:[%s889_s23 + $0xb] sm:$0x1] }
  0x45   : > { %v359_v37 = vld [vmem:[%s889_s23 + $0x3a] sm:$0x1]  ;;  %v364_v38 = vrot.slane %v357_v33, 7  ;;  %v366_v39 = vrot.slane %v358_v34, 6  ;;  %592 = vst.msk [vmem:[%s914_s18 + $0x20] sm:$0xf] %vm201_vm3, %v335_v35  ;;  %v350_v41 = vsel %vm195_vm1, %v349_v29, %v348_v36 }
  0x46   : > { %v368_v42 = vrot.slane %v359_v37, 5  ;;  %v374_v43 = vld [vmem:[%s889_s23 + $0x1b] sm:$0x1]  ;;  %v375_v44 = vld [vmem:[%s889_s23 + $0x2b] sm:$0x1]  ;;  %v352_v45 = vsel %vm198_vm2, %v351_v32, %v350_v41 }
  0x47   : > { %v365_v46 = vsel %vm192_vm0, %v364_v38, %v356_v30  ;;  %v376_v47 = vld [vmem:[%s889_s23 + $0x3b] sm:$0x1]  ;;  %v381_v48 = vrot.slane %v374_v43, 7  ;;  %v383_v49 = vrot.slane %v375_v44, 6  ;;  %v390_v50 = vld [vmem:[%s889_s23 + $0xc] sm:$0x1] }
  0x48   : > { %593 = vst.msk [vmem:[%s914_s18 + $0x24] sm:$0xf] %vm201_vm3, %v352_v45  ;;  %v367_v51 = vsel %vm195_vm1, %v366_v39, %v365_v46  ;;  %v385_v52 = vrot.slane %v376_v47, 5  ;;  %v391_v53 = vld [vmem:[%s889_s23 + $0x1c] sm:$0x1] }
  0x49   : > { %v392_v54 = vld [vmem:[%s889_s23 + $0x2c] sm:$0x1]  ;;  %v369_v55 = vsel %vm198_vm2, %v368_v42, %v367_v51  ;;  %v382_v56 = vsel %vm192_vm0, %v381_v48, %v373_v40  ;;  %v393_v57 = vld [vmem:[%s889_s23 + $0x3c] sm:$0x1]  ;;  %v398_v58 = vrot.slane %v391_v53, 7 }
  0x4a   : > { %v400_v59 = vrot.slane %v392_v54, 6  ;;  %v407_v60 = vld [vmem:[%s889_s23 + $0xd] sm:$0x1]  ;;  %594 = vst.msk [vmem:[%s914_s18 + $0x28] sm:$0xf] %vm201_vm3, %v369_v55  ;;  %v384_v61 = vsel %vm195_vm1, %v383_v49, %v382_v56  ;;  %v402_v62 = vrot.slane %v393_v57, 5 }
  0x4b   : > { %v408_v63 = vld [vmem:[%s889_s23 + $0x1d] sm:$0x1]  ;;  %v409_v0 = vld [vmem:[%s889_s23 + $0x2d] sm:$0x1]  ;;  %v386_v1 = vsel %vm198_vm2, %v385_v52, %v384_v61  ;;  %v399_v2 = vsel %vm192_vm0, %v398_v58, %v390_v50  ;;  %v424_v6 = vld [vmem:[%s889_s23 + $0xe] sm:$0x1] }
  0x4c   : > { %v410_v3 = vld [vmem:[%s889_s23 + $0x3d] sm:$0x1]  ;;  %v415_v4 = vrot.slane %v408_v63, 7  ;;  %v417_v5 = vrot.slane %v409_v0, 6  ;;  %595 = vst.msk [vmem:[%s914_s18 + $0x2c] sm:$0xf] %vm201_vm3, %v386_v1  ;;  %v401_v7 = vsel %vm195_vm1, %v400_v59, %v399_v2 }
  0x4d   : > { %v419_v8 = vrot.slane %v410_v3, 5  ;;  %v425_v9 = vld [vmem:[%s889_s23 + $0x1e] sm:$0x1]  ;;  %v426_v10 = vld [vmem:[%s889_s23 + $0x2e] sm:$0x1]  ;;  %v403_v11 = vsel %vm198_vm2, %v402_v62, %v401_v7 }
  0x4e   : > { %v416_v12 = vsel %vm192_vm0, %v415_v4, %v407_v60  ;;  %v427_v13 = vld [vmem:[%s889_s23 + $0x3e] sm:$0x1]  ;;  %v432_v14 = vrot.slane %v425_v9, 7  ;;  %v434_v15 = vrot.slane %v426_v10, 6  ;;  %v441_v16 = vld [vmem:[%s889_s23 + $0xf] sm:$0x1] }
  0x4f   : > { %596 = vst.msk [vmem:[%s914_s18 + $0x30] sm:$0xf] %vm201_vm3, %v403_v11  ;;  %v418_v17 = vsel %vm195_vm1, %v417_v5, %v416_v12  ;;  %v436_v18 = vrot.slane %v427_v13, 5  ;;  %v442_v19 = vld [vmem:[%s889_s23 + $0x1f] sm:$0x1] }
  0x50   : > { %v443_v20 = vld [vmem:[%s889_s23 + $0x2f] sm:$0x1]  ;;  %v420_v21 = vsel %vm198_vm2, %v419_v8, %v418_v17  ;;  %v433_v22 = vsel %vm192_vm0, %v432_v14, %v424_v6  ;;  %v444_v23 = vld [vmem:[%s889_s23 + $0x3f] sm:$0x1]  ;;  %v449_v24 = vrot.slane %v442_v19, 7 }
  0x51   : > { %v451_v25 = vrot.slane %v443_v20, 6  ;;  %597 = vst.msk [vmem:[%s914_s18 + $0x34] sm:$0xf] %vm201_vm3, %v420_v21  ;;  %v435_v26 = vsel %vm195_vm1, %v434_v15, %v433_v22  ;;  %v453_v27 = vrot.slane %v444_v23, 5 }
  0x52   : > { %v437_v28 = vsel %vm198_vm2, %v436_v18, %v435_v26  ;;  %v450_v29 = vsel %vm192_vm0, %v449_v24, %v441_v16 }
  0x53   : > { %598 = vst.msk [vmem:[%s914_s18 + $0x38] sm:$0xf] %vm201_vm3, %v437_v28  ;;  %v452_v30 = vsel %vm195_vm1, %v451_v25, %v450_v29 }
  0x54   : > { %v454_v31 = vsel %vm198_vm2, %v453_v27, %v452_v30 }
  0x55   : > { %599 = vst.msk [vmem:[%s914_s18 + $0x3c] sm:$0xf] %vm201_vm3, %v454_v31 }
  0x56   : > { %714 = shalt.err (!%p711_p6)
}
  0x57   : > { %s715_s4 = scalar_lea.hbm %s1042_s27, 1024  ;;  %s719_s13 = scalar_lea.hbm %s1099_s1, 2048 }
  0x58   : > { %p716_p7 = scmp.ne.s32.totalorder %s1042_s27, %s715_s4  ;;  %p720_p13 = scmp.lt.s32.totalorder %s1042_s27, %s1099_s1 }
  0x59   : > { %p721_p2 = scmp.lt.s32.totalorder %s719_s13, %s715_s4 }
  0x5a   : > { %p717_p10 = pnand %p716_p7, %p850_p9 }
  0x5b   : > { %p722_p8 = por %p721_p2, %p720_p13 }
  0x5c   : > { %p718_p4 = pneg %p717_p10 }
  0x5e   : > { %p723_p12 = pnand %p722_p8, %p718_p4 }
  0x60   : > { %726 = shalt.err (!%p723_p12)
}
  0x61   : > { %s787_s22 = smov 64   ;;  %s788_s23 = smov 4  }
  0x62   : > { %609 = dma.vmem_to_hbm [thread:$0]  (%p850_p9), %s1044_s25, 1024, %s1042_s27, %s459_s28, %s787_s22, %s787_s22, %s788_s23  }
  0x63 PF: > { %s491_s18 = sand.u32 1, %s761_s6   ;;  %p1105_p0 = scmp.ge.s32.totalorder %s781_s11, 2 }
  0x64   : > { %s492_s24 = scalar_lea.sflag [#allocation4], %s491_s18 }
  0x65   : > { %p616_p1 = pnand %p1105_p0, %p857_p11 }
  0x67   : > { %p617_p3 = pneg %p616_p1 }
  0x69   : > { %756 = dma.done.wait (%p617_p3), %s492_s24, 1024  }
  0x6a   : > { %758 = vsyncadd (%p617_p3), %s492_s24, 4294966272  ;;  %s17_s11 = sadd.s32 1, %s781_s11   ;;  %s1106_s6 = smov %s765_s7 }
  0x6b   : > { %p14_p5 = scmp.ge.s32.totalorder %s17_s11, 4   ;;  %s1107_s7 = smov %s769_s8 }
  0x6c   : > { %s1108_s8 = smov %s855_s20  ;;  %s1109_s9 = smov %s777_s10 }
  0x6d   : > { %s1110_s10 = smov %s1112_s14  ;;  %16 = sbr.rel (!%p14_p5) target bundleno = 6 (0x6), region = 84 }
  0x72   :  { %497 = vsyncpa [#allocation3], 1 }
  0x73   :  { %499 = vsyncpa [#allocation3 + $0x1], 1 }
  0x74   :  { %500 = vsyncpa [#allocation4], 1 }
  0x75   :  { %502 = vsyncpa [#allocation4 + $0x1], 1 }

</bundles_post_ra>
